<compile_context>
chip_gen: v7x
topology: tpu7x:2x2x1
jax: 0.10.0
libtpu: 0.0.40
codegen_flags: <defaults>
</compile_context>

<pallas_src>
import functools

import jax
import jax.numpy as jnp
from jax import lax
from jax.experimental import pallas as pl
from jax.experimental.pallas import tpu as pltpu

# Module hyperparameters (fixed by the PyTorch source)
N_EMBD = 256 + 128 + 64   # 448
BLOCK_SIZE = 256          # max sequence length (tril buffer size)
LANE = 128                # TPU lane width


def fuse_qkv_weight(w_key, w_query, w_value):
    """Precompute once (module init): fused [K | Q | V | 0] bf16 weight.

    w_* : (C, H) f32  ->  (C, ceil(3H/128)*128) bf16
    """
    C, H = w_key.shape
    total = 3 * H
    padded = max(LANE, ((total + LANE - 1) // LANE) * LANE)
    parts = [w_key, w_query, w_value]
    if padded > total:
        parts.append(jnp.zeros((C, padded - total), dtype=w_key.dtype))
    return jnp.concatenate(parts, axis=1).astype(jnp.bfloat16)


def _head_kernel(x_ref, w_ref, o_ref, *, head_size):
    """One grid step = `block_batch` batch elements; whole T resident in VMEM.

    x_ref : (BB, T, C)       bf16
    w_ref : (C, QKV_W)       bf16  fused [K | Q | V | 0] weight (64 lanes each)
    o_ref : (BB, T, H)       f32   (exact head width, no padding)
    """
    bb, t, c = x_ref.shape
    h = head_size

    # Fused QKV projection: one wide MXU pass (N = 256) with f32 accumulation.
    x2 = x_ref[...].reshape(bb * t, c)                         # bf16 (BB*T, C)
    qkv = jnp.dot(x2, w_ref[...],
                  preferred_element_type=jnp.float32)          # (BB*T, QKV_W) f32
    qkv = qkv.reshape(bb, t, w_ref.shape[1])

    # 64-wide static slices of the projection result.
    k = qkv[..., 0:h]                                          # (BB, T, H)
    q = qkv[..., h:2 * h]
    v = qkv[..., 2 * h:3 * h]

    # Scale q (T x H work) instead of the (T x T) score matrix.
    scale = jnp.float32(h ** -0.5)
    qb = (q * scale).astype(jnp.bfloat16)
    kb = k.astype(jnp.bfloat16)

    # Scores: contract last dims directly (no explicit transpose of k).
    wei = jnp.einsum('bqh,bkh->bqk', qb, kb,
                     preferred_element_type=jnp.float32)       # (BB, T, T) f32

    # Causal mask (tril): col > row -> -inf (diagonal always unmasked).
    row = lax.broadcasted_iota(jnp.int32, (t, t), 0)
    col = lax.broadcasted_iota(jnp.int32, (t, t), 1)
    wei = jnp.where((col <= row)[None, :, :], wei, -jnp.inf)

    # Numerically stable softmax in f32; normalization deferred past the PV
    # matmul so the VPU multiply is (T, H)-shaped, not (T, T)-shaped.
    m = jnp.max(wei, axis=-1, keepdims=True)
    e = jnp.exp(wei - m)
    s = jnp.sum(e, axis=-1, keepdims=True)

    # Dropout: eval-mode identity.

    out = jnp.einsum('bqk,bkh->bqh',
                     e.astype(jnp.bfloat16), v.astype(jnp.bfloat16),
                     preferred_element_type=jnp.float32)       # (BB, T, H)
    out = out * pl.reciprocal(s, approx=True)                  # EUP slot
    o_ref[...] = out.astype(o_ref.dtype)


def _per_element_vmem_bytes(T, C, H, qkv_w):
    """Rough per-batch-element VMEM footprint for one grid step."""
    return (2 * T * C * 2        # x bf16, double-buffered
            + T * qkv_w * 4      # qkv f32
            + 3 * T * H * 4      # k/q/v slice materializations (worst case)
            + 2 * T * H * 2      # qb/kb bf16
            + 2 * T * T * 4      # wei + exp f32
            + T * T * 2          # exp cast to bf16
            + T * H * 4          # out f32 value
            + 2 * T * H * 4)     # out buffer, double-buffered


def _pick_block_batch(B, T, C, H, qkv_w):
    """Largest batch fold that (a) fits a conservative VMEM budget and
    (b) leaves >= 2 grid steps so v7x's second TensorCore stays busy."""
    per = max(1, _per_element_vmem_bytes(T, C, H, qkv_w))
    cap = max(1, min(8, (14 << 20) // per))
    best = 1
    for bb in range(1, min(B, cap) + 1):
        if B % bb == 0 and (B // bb >= 2 or B == 1):
            best = bb
    return best


def head_forward(x, w_qkv, head_size, *, block_batch=None, out_dtype=jnp.float32):
    """x: (B, T, C) (cast to bf16 at the boundary); w_qkv: fused (C, QKV_W) bf16
    from fuse_qkv_weight(). Returns (B, T, head_size) in `out_dtype`."""
    B, T, C = x.shape
    qkv_w = w_qkv.shape[1]
    assert C == N_EMBD and T <= BLOCK_SIZE
    assert w_qkv.shape[0] == C and qkv_w >= 3 * head_size

    if x.dtype != jnp.bfloat16:
        # In the full model the upstream layer would already emit bf16.
        x = x.astype(jnp.bfloat16)

    if block_batch is None:
        block_batch = _pick_block_batch(B, T, C, head_size, qkv_w)
    assert B % block_batch == 0
    grid_b = B // block_batch

    weight_bytes = C * qkv_w * 2
    vmem_limit = int(min(
        max(32 << 20,
            weight_bytes + 2 * block_batch * _per_element_vmem_bytes(T, C, head_size, qkv_w)),
        48 << 20))   # stays under v7x's 64 MiB/TC physical VMEM

    kernel = functools.partial(_head_kernel, head_size=head_size)

    return pl.pallas_call(
        kernel,
        out_shape=jax.ShapeDtypeStruct((B, T, head_size), out_dtype),
        grid_spec=pltpu.PrefetchScalarGridSpec(
            num_scalar_prefetch=0,
            grid=(grid_b,),
            in_specs=[
                pl.BlockSpec((block_batch, T, C), lambda b: (b, 0, 0)),   # x tile (bf16)
                pl.BlockSpec((C, qkv_w), lambda b: (0, 0)),               # fused weight (resident)
            ],
            out_specs=pl.BlockSpec((block_batch, T, head_size),
                                   lambda b: (b, 0, 0)),
        ),
        compiler_params=pltpu.CompilerParams(
            dimension_semantics=("parallel",),
            vmem_limit_bytes=vmem_limit),
    )(x, w_qkv)


def head_reference(x, w_key, w_query, w_value):
    """Pure-JAX f32 reference matching the PyTorch forward (eval mode)."""
    k = x @ w_key
    q = x @ w_query
    v = x @ w_value
    wei = (q @ jnp.swapaxes(k, -2, -1)) * (k.shape[-1] ** -0.5)
    T = x.shape[1]
    mask = jnp.tril(jnp.ones((T, T), dtype=bool))
    wei = jnp.where(mask, wei, -jnp.inf)
    wei = jax.nn.softmax(wei, axis=-1)
    return wei @ v


if __name__ == "__main__":
    B = 2          # batch
    T = 8          # sequence length (<= block_size)
    C = N_EMBD     # 448, fixed by module
    HEAD_SIZE = 64

    key = jax.random.PRNGKey(0)
    kx, kk, kq, kv = jax.random.split(key, 4)

    x = jax.random.normal(kx, (B, T, C), dtype=jnp.float32)
    # nn.Linear(C, H, bias=False) weight is (H, C); store transposed (C, H).
    bound = 1.0 / (C ** 0.5)
    w_key = jax.random.uniform(kk, (C, HEAD_SIZE), jnp.float32, -bound, bound)
    w_query = jax.random.uniform(kq, (C, HEAD_SIZE), jnp.float32, -bound, bound)
    w_value = jax.random.uniform(kv, (C, HEAD_SIZE), jnp.float32, -bound, bound)

    # Precompute the fused/padded/bf16 weight once (module-init time).
    w_qkv = fuse_qkv_weight(w_key, w_query, w_value)
    # Activations enter the kernel in bf16 (one-time cast here; upstream layers
    # would provide bf16 directly in a real model).
    x_bf16 = x.astype(jnp.bfloat16)

    out = head_forward(x_bf16, w_qkv, HEAD_SIZE)
    out = jax.block_until_ready(out)

    ref = head_reference(x, w_key, w_query, w_value)
    assert out.shape == (B, T, HEAD_SIZE)
    # bf16 activations/MXU operands + approx EUP reciprocal vs. pure-f32 ref.
    assert jnp.allclose(out, ref, atol=5e-2, rtol=5e-2), "mismatch vs reference"

    print("KERNEL_OK")
</pallas_src>

<mosaic_0001>
module attributes {stable_mosaic.version = 11 : i64} {
  func.func @_head_kernel(%arg0: i32, %arg1: memref<1x8x448xbf16, #tpu.memory_space<vmem>>, %arg2: memref<448x256xbf16, #tpu.memory_space<vmem>>, %arg3: memref<1x8x64xf32, #tpu.memory_space<vmem>>) attributes {dimension_semantics = [#tpu.dimension_semantics<parallel>], iteration_bounds = array<i64: 2>, scalar_prefetch = 0 : i64, scratch_operands = 0 : i64, tpu.core_type = #tpu.core_type<tc>, window_params = [{transform_indices = @transform_0, window_bounds = array<i64: 1, 8, 448>}, {pipeline_mode = #tpu.pipeline_mode<synchronous>, transform_indices = @transform_1, window_bounds = array<i64: 448, 256>}, {transform_indices = @transform_2, window_bounds = array<i64: 1, 8, 64>}]} {
    %c0 = arith.constant 0 : index
    %c0_0 = arith.constant 0 : index
    %c0_1 = arith.constant 0 : index
    %0 = vector.load %arg1[%c0, %c0_0, %c0_1] : memref<1x8x448xbf16, #tpu.memory_space<vmem>>, vector<1x8x448xbf16>
    %1 = vector.shape_cast %0 : vector<1x8x448xbf16> to vector<8x448xbf16>
    %c0_2 = arith.constant 0 : index
    %c0_3 = arith.constant 0 : index
    %2 = vector.load %arg2[%c0_2, %c0_3] : memref<448x256xbf16, #tpu.memory_space<vmem>>, vector<448x256xbf16>
    %cst = arith.constant dense<0.000000e+00> : vector<8x256xf32>
    %3 = tpu.matmul %1, %2, %cst {dimension_numbers = #tpu.dot_dimension_numbers<[1], [0], [0], [1], [0, 0, 1, 1], [], []>} : vector<8x448xbf16>, vector<448x256xbf16>, vector<8x256xf32> -> vector<8x256xf32>
    %4 = vector.shape_cast %3 : vector<8x256xf32> to vector<1x8x256xf32>
    %5 = vector.extract_strided_slice %4 {offsets = [0, 0, 0], sizes = [1, 8, 64], strides = [1, 1, 1]} : vector<1x8x256xf32> to vector<1x8x64xf32>
    %6 = vector.extract_strided_slice %4 {offsets = [0, 0, 64], sizes = [1, 8, 64], strides = [1, 1, 1]} : vector<1x8x256xf32> to vector<1x8x64xf32>
    %7 = vector.extract_strided_slice %4 {offsets = [0, 0, 128], sizes = [1, 8, 64], strides = [1, 1, 1]} : vector<1x8x256xf32> to vector<1x8x64xf32>
    %cst_4 = arith.constant 1.250000e-01 : f32
    %8 = vector.broadcast %cst_4 : f32 to vector<1x8x64xf32>
    %9 = arith.mulf %6, %8 : vector<1x8x64xf32>
    %10 = arith.truncf %9 : vector<1x8x64xf32> to vector<1x8x64xbf16>
    %11 = arith.truncf %5 : vector<1x8x64xf32> to vector<1x8x64xbf16>
    "tpu.trace_start"() <{level = 10 : i32, message = "bqh,bkh->bqk"}> : () -> ()
    %cst_5 = arith.constant dense<0.000000e+00> : vector<1x8x8xf32>
    %12 = tpu.matmul %10, %11, %cst_5 {dimension_numbers = #tpu.dot_dimension_numbers<[2], [2], [1], [1], [0, 0, 0, 1, 1, 1], [0], [0]>} : vector<1x8x64xbf16>, vector<1x8x64xbf16>, vector<1x8x8xf32> -> vector<1x8x8xf32>
    "tpu.trace_stop"() : () -> ()
    %13 = tpu.iota {dimensions = array<i32: 0>} : vector<8x8xi32>
    %14 = tpu.iota {dimensions = array<i32: 1>} : vector<8x8xi32>
    %15 = arith.cmpi sle, %14, %13 : vector<8x8xi32>
    %16 = vector.shape_cast %15 : vector<8x8xi1> to vector<1x8x8xi1>
    %cst_6 = arith.constant 0xFF800000 : f32
    %17 = vector.broadcast %cst_6 : f32 to vector<1x8x8xf32>
    %18 = arith.select %16, %12, %17 : vector<1x8x8xi1>, vector<1x8x8xf32>
    %cst_7 = arith.constant dense<0xFF800000> : vector<1x8xf32>
    %19 = vector.multi_reduction <maximumf>, %18, %cst_7 [2] : vector<1x8x8xf32> to vector<1x8xf32>
    %20 = vector.shape_cast %19 : vector<1x8xf32> to vector<1x8x1xf32>
    %21 = vector.broadcast %20 : vector<1x8x1xf32> to vector<1x8x8xf32>
    %22 = arith.subf %18, %21 : vector<1x8x8xf32>
    %23 = math.exp %22 : vector<1x8x8xf32>
    %cst_8 = arith.constant dense<0.000000e+00> : vector<1x8xf32>
    %24 = vector.multi_reduction <add>, %23, %cst_8 [2] : vector<1x8x8xf32> to vector<1x8xf32>
    %25 = vector.shape_cast %24 : vector<1x8xf32> to vector<1x8x1xf32>
    %26 = arith.truncf %23 : vector<1x8x8xf32> to vector<1x8x8xbf16>
    %27 = arith.truncf %7 : vector<1x8x64xf32> to vector<1x8x64xbf16>
    "tpu.trace_start"() <{level = 10 : i32, message = "bqk,bkh->bqh"}> : () -> ()
    %cst_9 = arith.constant dense<0.000000e+00> : vector<1x8x64xf32>
    %28 = tpu.matmul %26, %27, %cst_9 {dimension_numbers = #tpu.dot_dimension_numbers<[2], [1], [1], [2], [0, 0, 0, 1, 1, 2], [0], [0]>} : vector<1x8x8xbf16>, vector<1x8x64xbf16>, vector<1x8x64xf32> -> vector<1x8x64xf32>
    "tpu.trace_stop"() : () -> ()
    %29 = tpu.reciprocal %25 {approx = true} : vector<1x8x1xf32> -> vector<1x8x1xf32>
    %30 = vector.broadcast %29 : vector<1x8x1xf32> to vector<1x8x64xf32>
    %31 = arith.mulf %28, %30 : vector<1x8x64xf32>
    %c0_10 = arith.constant 0 : index
    %c0_11 = arith.constant 0 : index
    %c0_12 = arith.constant 0 : index
    %32 = vector.load %arg3[%c0_10, %c0_11, %c0_12] : memref<1x8x64xf32, #tpu.memory_space<vmem>>, vector<1x8x64xf32>
    tpu.vector_store %arg3[%c0_10, %c0_11, %c0_12], %31 {strides = array<i32>} : memref<1x8x64xf32, #tpu.memory_space<vmem>>, vector<1x8x64xf32>,
    return
  }
  func.func @transform_0(%arg0: i32) -> (i32, i32, i32) {
    %c0_i32 = arith.constant 0 : i32
    %c0_i32_0 = arith.constant 0 : i32
    %c0_i32_1 = arith.constant 0 : i32
    return %arg0, %c0_i32, %c0_i32_0 : i32, i32, i32
  }
  func.func @transform_1(%arg0: i32) -> (i32, i32) {
    %c0_i32 = arith.constant 0 : i32
    %c0_i32_0 = arith.constant 0 : i32
    %c0_i32_1 = arith.constant 0 : i32
    return %c0_i32, %c0_i32_0 : i32, i32
  }
  func.func @transform_2(%arg0: i32) -> (i32, i32, i32) {
    %c0_i32 = arith.constant 0 : i32
    %c0_i32_0 = arith.constant 0 : i32
    %c0_i32_1 = arith.constant 0 : i32
    return %arg0, %c0_i32, %c0_i32_0 : i32, i32, i32
  }
}

</mosaic_0001>

<bundles_post_ra>
// kernel: tpu_custom_call.1
= control target key start
LH: loop header
LB: loop body
LE: loop exit
PB: predicated region body
PF: predicated region fallthrough
CT: control target
= control target key end

     0   :  { %7 = vsyncpa [#allocation3], 0  ;;  %s1441_s0 = inlined_call_operand.hbm [shape: bf16[2,8,448], index: 0, kind: input, shape index: {}]   ;;  %s1442_s1 = inlined_call_operand.hbm [shape: bf16[448,256], index: 1, kind: input, shape index: {}]   ;;  %s1443_s2 = inlined_call_operand.hbm [shape: f32[2,8,64], index: 2, kind: output, shape index: {}]  }
   0x1   :  { %9 = vsyncpa [#allocation3 + $0x1], 0 }
   0x2   :  { %10 = vsyncpa [#allocation6], 0 }
   0x3   :  { %11 = vsyncpa [#allocation4], 0 }
   0x4   :  { %13 = vsyncpa [#allocation4 + $0x1], 0  ;;  %s1231_s9 = smov 0   ;;  %s1233_s10 = smov 0  }
   0x5   :  { %s1235_s11 = smov 0   ;;  %s1237_s12 = smov 0  }
   0x6 LB: > { %s1252_s13 = sadd.s32 4294967295, %s1206_s12   ;;  %s827_s14 = sadd.s32 4294967294, %s1206_s12   ;;  %s1206_s12 = sphi %s1237_s12, %s1463_s12   ;;  %s1202_s11 = sphi %s1235_s11, %s1462_s11   ;;  %s1198_s10 = sphi %s1233_s10, %s1461_s10   ;;  %s1194_s9 = sphi %s1231_s9, %s1460_s9  }
   0x7   : > { %p39_p0 = scmp.ne.s32.totalorder %s1198_s10, %s1194_s9  ;;  %p1444_p1 = scmp.eq.s32.totalorder %s1252_s13, 0 }
   0x8   : > { %p90_p3 = scmp.eq.s32.totalorder %s827_s14, 1  ;;  %p828_p5 = scmp.ge.s32.totalorder %s1206_s12, 1 }
   0x9   : > { %p1261_p4 = por %p1444_p1, %p39_p0  ;;  %p97_p7 = scmp.lt.s32.totalorder %s1206_s12, 3 }
   0xa   : > { %p1266_p6 = por %p90_p3, %p39_p0  ;;  %s1208_s18 = smov [#allocation5]  }
   0xb   : > { %s1447_s15 = scalar_select %p1261_p4, 1, 0 }
   0xc   : > { %s1448_s16 = scalar_select %p1266_p6, 1, 0 }
   0xd   : > { %p1271_p8 = pnand %p828_p5, %p97_p7  ;;  %s109_s19 = sshll.u32 %s1208_s18, 4  ;;  %s1275_s19 = int_to_ptr.vmem [resolvable:$true] %s109_s19 }
   0xe   : > { %s1287_s21 = sadd.s32 1, %s1206_s12   ;;  %s26_s22 = sadd.s32 1, %s1202_s11 }
   0xf   : > { %s1449_s17 = scalar_select %p1271_p8, 1, 0 }
  0x10   : > { %p932_p9 = pneg %p1271_p8  ;;  %s23_s23 = ssub.s32 %s1206_s12, %s1287_s21 }
  0x11   : > { %s1078_s26 = scalar_lea.hbm %s1442_s1, 7168 }
  0x12   : > { %p1282_p11 = pnand %p932_p9, %p1444_p1  ;;  %p1079_p12 = scmp.ne.s32.totalorder %s1442_s1, %s1078_s26 }
  0x13   : > { %p1085_p5 = scmp.lt.u32.totalorder %s1078_s26, %s1442_s1 }
  0x14   : > { %p1080_p13 = pneg %p1282_p11 }
  0x16   : > { %p1081_p0 = pnand %p1080_p13, %p1079_p12 }
  0x18   : > { %p1082_p3 = pneg %p1081_p0 }
  0x1a   : > { %p1087_p7 = pnand %p1085_p5, %p1082_p3 }
  0x1c   : > { %1090 = shalt.err (!%p1087_p7)
}
  0x1d   : > { %s1091_s3 = scalar_lea.vmem %s1275_s19, 7168  ;;  %p1099_p2 = scmp.lt.s32.totalorder %s1275_s19, %s1275_s19 }
  0x1e   : > { %p1092_p9 = scmp.ne.s32.totalorder %s1275_s19, %s1091_s3  ;;  %p1100_p6 = scmp.lt.s32.totalorder %s1091_s3, %s1091_s3 }
  0x20   : > { %p1094_p10 = pnand %p1092_p9, %p1080_p13  ;;  %p1101_p4 = por %p1100_p6, %p1099_p2 }
  0x22   : > { %p1095_p1 = pneg %p1094_p10 }
  0x24   : > { %p1102_p8 = pnand %p1101_p4, %p1095_p1 }
  0x26   : > { %1105 = shalt.err (!%p1102_p8)
}
  0x27   : > { %s1209_s4 = smov 128   ;;  %s1210_s5 = smov 8  }
  0x28   : > { %935 = dma.hbm_to_vmem [thread:$0]  (!%p1282_p11), %s1442_s1, 7168, %s1275_s19, [#allocation6], %s1209_s4, %s1209_s4, %s1210_s5  }
  0x29   : > { %p24_p2 = scmp.eq.s32.totalorder %s23_s23, 0  ;;  %p33_p1 = scmp.ne.s32.totalorder %s1202_s11, %s1198_s10 }
  0x2a   : > { %p34_p4 = scmp.eq.s32.totalorder %s1206_s12, 0  ;;  %p945_p6 = scmp.lt.s32.totalorder %s1206_s12, 2 }
  0x2b   : > { %s1318_s8 = scalar_select %p24_p2, %s1202_s11, %s26_s22  }
  0x2c   : > { %p35_p8 = por %p34_p4, %p33_p1  ;;  %p1451_p10 = scmp.eq.s32.totalorder %s1252_s13, 1 }
  0x2d   : > { %s123_s18 = sand.u32 1, %s1202_s11   ;;  %s905_s24 = sshll.u32 %s1206_s12, 8 }
  0x2e   : > { %p1322_p12 = por %p1451_p10, %p33_p1  ;;  %s831_s25 = sshll.u32 %s123_s18, 4 }
  0x2f   : > { %s1331_s27 = scalar_lea.hbm %s1441_s0, %s905_s24  ;;  %s127_s19 = scalar_lea.vmem [#allocation2], %s831_s25 }
  0x30   : > { %s135_s22 = sshll.u32 %s127_s19, 4  ;;  %p1333_p11 = pnand %p945_p6, %p35_p8  ;;  %s1337_s22 = int_to_ptr.vmem [resolvable:$true] %s135_s22 }
  0x31   : > { %s124_s28 = scalar_lea.sflag [#allocation3], %s123_s18  ;;  %s1106_s29 = scalar_lea.hbm %s1331_s27, 256 }
  0x32   : > { %p1107_p13 = scmp.ne.s32.totalorder %s1331_s27, %s1106_s29  ;;  %p1108_p0 = pneg %p1333_p11 }
  0x33   : > { %s1111_s4 = scalar_lea.hbm %s1441_s0, 512  ;;  %p1112_p7 = scmp.lt.u32.totalorder %s1331_s27, %s1441_s0 }
  0x34   : > { %p1109_p3 = pnand %p1108_p0, %p1107_p13  ;;  %p1113_p9 = scmp.lt.u32.totalorder %s1111_s4, %s1106_s29 }
  0x35   : > { %p1115_p1 = scmp.lt.u32.totalorder %s1106_s29, %s1331_s27 }
  0x36   : > { %p1110_p5 = pneg %p1109_p3  ;;  %p1114_p2 = por %p1113_p9, %p1112_p7 }
  0x38   : > { %p1116_p4 = por %p1115_p1, %p1114_p2 }
  0x3a   : > { %p1117_p6 = pnand %p1116_p4, %p1110_p5 }
  0x3c   : > { %1120 = shalt.err (!%p1117_p6)
}
  0x3d   : > { %s1121_s7 = scalar_lea.vmem %s1337_s22, 256  ;;  %s1211_s18 = smov [#allocation2]  }
  0x3e   : > { %p1122_p8 = scmp.ne.s32.totalorder %s1337_s22, %s1121_s7  ;;  %s1126_s24 = sshll.u32 %s1211_s18, 4  ;;  %s1127_s24 = int_to_ptr.vmem [resolvable:$false] %s1126_s24 }
  0x3f   : > { %s1128_s25 = scalar_lea.vmem %s1127_s24, 512  ;;  %p1129_p3 = scmp.lt.s32.totalorder %s1337_s22, %s1127_s24 }
  0x40   : > { %p1124_p10 = pnand %p1122_p8, %p1108_p0  ;;  %p1130_p7 = scmp.lt.s32.totalorder %s1128_s25, %s1121_s7 }
  0x42   : > { %p1125_p13 = pneg %p1124_p10  ;;  %p1131_p9 = por %p1130_p7, %p1129_p3 }
  0x44   : > { %p1132_p2 = pnand %p1131_p9, %p1125_p13 }
  0x46   : > { %1135 = shalt.err (!%p1132_p2)
}
  0x47   : > { %939 = dma.hbm_to_vmem [thread:$0]  (!%p1333_p11), %s1331_s27, 256, %s1337_s22, %s124_s28  }
  0x48   : > { %p1454_p5 = scmp.ne.s32.totalorder %s1449_s17, 0 }
  0x49   : > { %s1367_s20 = sand.u32 (!%p1454_p5), 1, %s1198_s10   ;;  %p1455_p0 = scmp.ne.s32.totalorder (!%p1454_p5), %s1447_s15, 0 }
  0x4a   : > { %144 = sbr.rel (%p1454_p5) target bundleno = 1084 (0x43c), region = 28  ;;  %s835_s26 = sshll.u32 (!%p1454_p5), %s1367_s20, 4 }
  0x4b   : > { %s147_s19 = scalar_lea.sflag (!%p1454_p5), [#allocation3], %s1367_s20  ;;  %s1371_s29 = scalar_lea.vmem (!%p1454_p5), [#allocation2], %s835_s26 }
  0x51   : > { %1181 = dma.done.wait (%p1455_p0), %s147_s19, 256  }
  0x52   : > { %1183 = vsyncadd (%p1455_p0), %s147_s19, 4294967040  ;;  %p1456_p11 = scmp.eq.s32.totalorder %s1252_s13, 0 }
  0x54   : > { %1185 = dma.done.wait (%p1456_p11), [#allocation6], 7168   ;;  %p1457_p1 = pmov %p1456_p11 }
  0x55   : > { %v986_v0 = vld [vmem:[#allocation5 + $0x4] ss:$8 sps:$4 sm:$0xff]   ;;  %v988_v1 = vld [vmem:[#allocation5] ss:$8 sps:$4 sm:$0xff]   ;;  %v989_v2 = vld [vmem:[#allocation5 + $0x14] ss:$8 sps:$4 sm:$0xff]  }
  0x56   : > { %1187 = vsyncadd (%p1457_p1), [#allocation6], 4294960128  ;;  %531 = vmatprep.subr.bf16.mxu0 %v986_v0  ;;  %v991_v3 = vld [vmem:[#allocation5 + $0x10] ss:$8 sps:$4 sm:$0xff]   ;;  %v992_v4 = vld [vmem:[#allocation5 + $0x24] ss:$8 sps:$4 sm:$0xff]  }
  0x57   : > { %532 = vmatpush1.bf16.msra.mxu0 %v988_v1  ;;  %v998_v5 = vld [vmem:[#allocation5 + $0x104] ss:$8 sps:$4 sm:$0xff]   ;;  %v1000_v6 = vld [vmem:[#allocation5 + $0x100] ss:$8 sps:$4 sm:$0xff]   ;;  %v995_v8 = vld [vmem:[#allocation5 + $0x34] ss:$8 sps:$4 sm:$0xff]  }
  0x58   : > { %533 = vmatprep.subr.bf16.mxu0 %v989_v2  ;;  %v994_v7 = vld [vmem:[#allocation5 + $0x20] ss:$8 sps:$4 sm:$0xff]   ;;  %572 = vmatprep.subr.bf16.mxu1 %v998_v5  ;;  %v1004_v9 = vld [vmem:[#allocation5 + $0x114] ss:$8 sps:$4 sm:$0xff]   ;;  %v1006_v10 = vld [vmem:[#allocation5 + $0x110] ss:$8 sps:$4 sm:$0xff]  }
  0x59   : > { %573 = vmatpush1.bf16.msra.mxu1 %v1000_v6  ;;  %v997_v11 = vld [vmem:[#allocation5 + $0x30] ss:$8 sps:$4 sm:$0xff]   ;;  %v1010_v12 = vld [vmem:[#allocation5 + $0x124] ss:$8 sps:$4 sm:$0xff]   ;;  %v1012_v14 = vld [vmem:[#allocation5 + $0x120] ss:$8 sps:$4 sm:$0xff]  }
  0x5a   : > { %574 = vmatprep.subr.bf16.mxu1 %v1004_v9  ;;  %v1001_v13 = vld [vmem:[#allocation5 + $0x44] ss:$8 sps:$4 sm:$0xff]   ;;  %v1016_v15 = vld [vmem:[#allocation5 + $0x134] ss:$8 sps:$4 sm:$0xff]   ;;  %v1003_v16 = vld [vmem:[#allocation5 + $0x40] ss:$8 sps:$4 sm:$0xff]  }
  0x5b   : > { %534 = vmatpush1.bf16.msra.mxu0 %v991_v3  ;;  %v1007_v17 = vld [vmem:[#allocation5 + $0x54] ss:$8 sps:$4 sm:$0xff]   ;;  %v1018_v18 = vld [vmem:[#allocation5 + $0x130] ss:$8 sps:$4 sm:$0xff]   ;;  %v1022_v19 = vld [vmem:[#allocation5 + $0x144] ss:$8 sps:$4 sm:$0xff]  }
  0x5c   : > { %535 = vmatprep.subr.bf16.mxu0 %v992_v4  ;;  %v1009_v20 = vld [vmem:[#allocation5 + $0x50] ss:$8 sps:$4 sm:$0xff]   ;;  %v1013_v21 = vld [vmem:[#allocation5 + $0x64] ss:$8 sps:$4 sm:$0xff]   ;;  %v1024_v22 = vld [vmem:[#allocation5 + $0x140] ss:$8 sps:$4 sm:$0xff]  }
  0x5d   : > { %575 = vmatpush1.bf16.msra.mxu1 %v1006_v10  ;;  %v1028_v23 = vld [vmem:[#allocation5 + $0x154] ss:$8 sps:$4 sm:$0xff]   ;;  %v1015_v24 = vld [vmem:[#allocation5 + $0x60] ss:$8 sps:$4 sm:$0xff]   ;;  %v1030_v26 = vld [vmem:[#allocation5 + $0x150] ss:$8 sps:$4 sm:$0xff]  }
  0x5e   : > { %576 = vmatprep.subr.bf16.mxu1 %v1010_v12  ;;  %v1019_v25 = vld [vmem:[#allocation5 + $0x74] ss:$8 sps:$4 sm:$0xff]   ;;  %v1034_v27 = vld [vmem:[#allocation5 + $0x164] ss:$8 sps:$4 sm:$0xff]   ;;  %v1021_v28 = vld [vmem:[#allocation5 + $0x70] ss:$8 sps:$4 sm:$0xff]  }
  0x5f   : > { %536 = vmatpush1.bf16.msra.mxu0 %v994_v7  ;;  %v1025_v29 = vld [vmem:[#allocation5 + $0x84] ss:$8 sps:$4 sm:$0xff]   ;;  %v1036_v30 = vld [vmem:[#allocation5 + $0x160] ss:$8 sps:$4 sm:$0xff]   ;;  %v1040_v31 = vld [vmem:[#allocation5 + $0x174] ss:$8 sps:$4 sm:$0xff]  }
  0x60   : > { %537 = vmatprep.subr.bf16.mxu0 %v995_v8  ;;  %v1027_v32 = vld [vmem:[#allocation5 + $0x80] ss:$8 sps:$4 sm:$0xff]   ;;  %v1031_v33 = vld [vmem:[#allocation5 + $0x94] ss:$8 sps:$4 sm:$0xff]   ;;  %v1042_v34 = vld [vmem:[#allocation5 + $0x170] ss:$8 sps:$4 sm:$0xff]  }
  0x61   : > { %577 = vmatpush1.bf16.msra.mxu1 %v1012_v14  ;;  %v1046_v35 = vld [vmem:[#allocation5 + $0x184] ss:$8 sps:$4 sm:$0xff]   ;;  %v1033_v36 = vld [vmem:[#allocation5 + $0x90] ss:$8 sps:$4 sm:$0xff]   ;;  %v1048_v38 = vld [vmem:[#allocation5 + $0x180] ss:$8 sps:$4 sm:$0xff]  }
  0x62   : > { %578 = vmatprep.subr.bf16.mxu1 %v1016_v15  ;;  %v1037_v37 = vld [vmem:[#allocation5 + $0xa4] ss:$8 sps:$4 sm:$0xff]   ;;  %vm527_vm0 = vcmask 523264   ;;  %v1052_v41 = vld [vmem:[#allocation5 + $0x194] ss:$8 sps:$4 sm:$0xff]   ;;  %v1212_v62 = vmov 0.0  }
  0x63   : > { %538 = vmatpush1.bf16.msra.mxu0 %v997_v11  ;;  %v177_v39 = vld [vmem:[%s1371_s29 + $0x8] sm:$0xff]  ;;  %v176_v40 = vld [vmem:[%s1371_s29] sm:$0xff]  ;;  %vm1213_vm1 = vmmov 0   ;;  %s1214_s15 = smov 64   ;;  %vm686_vm2 = vcmask 1043456   ;;  %vm671_vm4 = vcmask 64512  }
  0x64   : > { %539 = vmatprep.subr.bf16.mxu0 %v1001_v13  ;;  %v841_v42 = vcombine.high %v177_v39, %v177_v39  ;;  %v839_v43 = vcombine.high %v176_v40, %v176_v40  ;;  %v1039_v44 = vld [vmem:[#allocation5 + $0xa0] ss:$8 sps:$4 sm:$0xff]   ;;  %v1043_v45 = vld [vmem:[#allocation5 + $0xb4] ss:$8 sps:$4 sm:$0xff]   ;;  %v1054_v46 = vld [vmem:[#allocation5 + $0x190] ss:$8 sps:$4 sm:$0xff]   ;;  %v840_v57 = vcombine.low %v177_v39, %v177_v39  ;;  %v838_v61 = vcombine.low %v176_v40, %v176_v40 }
  0x65   : > { %579 = vmatpush1.bf16.msra.mxu1 %v1018_v18  ;;  %v1058_v47 = vld [vmem:[#allocation5 + $0x1a4] ss:$8 sps:$4 sm:$0xff]   ;;  %v1045_v48 = vld [vmem:[#allocation5 + $0xb0] ss:$8 sps:$4 sm:$0xff]   ;;  %v1060_v50 = vld [vmem:[#allocation5 + $0x1a0] ss:$8 sps:$4 sm:$0xff]  }
  0x66   : > { %580 = vmatprep.subr.bf16.mxu1 %v1022_v19  ;;  %898 = vmatprep.mubr.msk.bf16.mxu1 %vm527_vm0, %v841_v42  ;;  %v1049_v49 = vld [vmem:[#allocation5 + $0xc4] ss:$8 sps:$4 sm:$0xff]   ;;  %v1064_v51 = vld [vmem:[#allocation5 + $0x1b4] ss:$8 sps:$4 sm:$0xff]   ;;  %v1051_v52 = vld [vmem:[#allocation5 + $0xc0] ss:$8 sps:$4 sm:$0xff]  }
  0x67   : > { %540 = vmatpush1.bf16.msra.mxu0 %v1003_v16  ;;  %563 = vmatprep.mubr.bf16.mxu0 %v839_v43  ;;  %v1055_v53 = vld [vmem:[#allocation5 + $0xd4] ss:$8 sps:$4 sm:$0xff]   ;;  %v1066_v54 = vld [vmem:[#allocation5 + $0x1b0] ss:$8 sps:$4 sm:$0xff]   ;;  %v1061_v56 = vld [vmem:[#allocation5 + $0xe4] ss:$8 sps:$4 sm:$0xff]   ;;  %v665_v16 = vlaneseq }
  0x68   : > { %541 = vmatprep.subr.bf16.mxu0 %v1007_v17  ;;  %v1057_v55 = vld [vmem:[#allocation5 + $0xd0] ss:$8 sps:$4 sm:$0xff]   ;;  %v1063_v58 = vld [vmem:[#allocation5 + $0xe0] ss:$8 sps:$4 sm:$0xff]   ;;  %v1067_v59 = vld [vmem:[#allocation5 + $0xf4] ss:$8 sps:$4 sm:$0xff]  }
  0x69   : > { %581 = vmatpush1.bf16.msra.mxu1 %v1024_v22  ;;  %v1071_v60 = vld [vmem:[#allocation5 + $0xf0] ss:$8 sps:$4 sm:$0xff]   ;;  %v666_v17 = vshrl.u32 %v665_v16, 7  ;;  %v668_v18 = vand.u32 127, %v665_v16  ;;  %s837_s17 = sshll.u32 %s1367_s20, 3  ;;  %s902_s27 = sshll.u32 %s1252_s13, 7 }
  0x6a   : > { %582 = vmatprep.subr.bf16.mxu1 %v1028_v23  ;;  %s174_s22 = scalar_lea.vmem [#allocation7], %s837_s17  ;;  %s1396_s3 = scalar_lea.hbm %s1443_s2, %s902_s27 }
  0x6b   : > { %542 = vmatpush1.bf16.msra.mxu0 %v1009_v20  ;;  %vm669_vm3 = vcmp.le.s32.totalorder %v668_v18, %v666_v17  ;;  %s747_s23 = sshll.u32 %s174_s22, 4  ;;  %s734_s13 = scalar_lea.sflag [#allocation4], %s1367_s20  ;;  %s1398_s23 = int_to_ptr.vmem [resolvable:$true] %s747_s23 }
  0x6c   : > { %543 = vmatprep.subr.bf16.mxu0 %v1013_v21  ;;  %s1136_s4 = scalar_lea.vmem %s1398_s23, 128  ;;  %s1215_s5 = smov [#allocation7]  }
  0x6d   : > { %583 = vmatpush1.bf16.msra.mxu1 %v1030_v26  ;;  %p1137_p4 = scmp.ne.s32.totalorder %s1398_s23, %s1136_s4  ;;  %s1140_s6 = sshll.u32 %s1215_s5, 4  ;;  %s1141_s6 = int_to_ptr.vmem [resolvable:$false] %s1140_s6 }
  0x6e   : > { %584 = vmatprep.subr.bf16.mxu1 %v1034_v27  ;;  %s1142_s7 = scalar_lea.vmem %s1141_s6, 256  ;;  %p1143_p10 = scmp.lt.s32.totalorder %s1398_s23, %s1141_s6 }
  0x6f   : > { %544 = vmatpush1.bf16.msra.mxu0 %v1015_v24  ;;  %p1138_p6 = pnand %p1137_p4, %p1322_p12  ;;  %p1144_p13 = scmp.lt.s32.totalorder %s1142_s7, %s1136_s4 }
  0x70   : > { %545 = vmatprep.subr.bf16.mxu0 %v1019_v25 }
  0x71   : > { %585 = vmatpush1.bf16.msra.mxu1 %v1036_v30  ;;  %p1139_p8 = pneg %p1138_p6  ;;  %p1145_p3 = por %p1144_p13, %p1143_p10 }
  0x72   : > { %586 = vmatprep.subr.bf16.mxu1 %v1040_v31 }
  0x73   : > { %546 = vmatpush1.bf16.msra.mxu0 %v1021_v28  ;;  %p1146_p7 = pnand %p1145_p3, %p1139_p8 }
  0x74   : > { %547 = vmatprep.subr.bf16.mxu0 %v1025_v29 }
  0x75   : > { %587 = vmatpush1.bf16.msra.mxu1 %v1042_v34 }
  0x76   : > { %588 = vmatprep.subr.bf16.mxu1 %v1046_v35 }
  0x77   : > { %548 = vmatpush1.bf16.msra.mxu0 %v1027_v32 }
  0x78   : > { %549 = vmatprep.subr.bf16.mxu0 %v1031_v33 }
  0x79   : > { %589 = vmatpush1.bf16.msra.mxu1 %v1048_v38 }
  0x7a   : > { %590 = vmatprep.subr.bf16.mxu1 %v1052_v41 }
  0x7b   : > { %550 = vmatpush1.bf16.msra.mxu0 %v1033_v36 }
  0x7c   : > { %551 = vmatprep.subr.bf16.mxu0 %v1037_v37 }
  0x7d   : > { %591 = vmatpush1.bf16.msra.mxu1 %v1054_v46 }
  0x7e   : > { %592 = vmatprep.subr.bf16.mxu1 %v1058_v47 }
  0x7f   : > { %552 = vmatpush1.bf16.msra.mxu0 %v1039_v44 }
  0x80   : > { %553 = vmatprep.subr.bf16.mxu0 %v1043_v45 }
  0x81   : > { %593 = vmatpush1.bf16.msra.mxu1 %v1060_v50 }
  0x82   : > { %594 = vmatprep.subr.bf16.mxu1 %v1064_v51 }
  0x83   : > { %554 = vmatpush1.bf16.msra.mxu0 %v1045_v48 }
  0x84   : > { %555 = vmatprep.subr.bf16.mxu0 %v1049_v49 }
  0x85   : > { %595 = vmatpush1.bf16.msra.mxu1 %v1066_v54 }
  0x86   : > { %910 = vmatprep.subr.bf16.mxu1 %v1212_v62 }
  0x87   : > { %556 = vmatpush1.bf16.msra.mxu0 %v1051_v52 }
  0x88   : > { %557 = vmatprep.subr.bf16.mxu0 %v1055_v53  ;;  %605 = vmatmul.mubr.bf16.vlgmr.msra.gmra.mrb[0].mxu1 %v840_v57 }
  0x89   : > { %912 = vmatprep.mubr.msk.bf16.mxu1 %vm1213_vm1, %v1212_v62 }
  0x8b   : > { %558 = vmatpush1.bf16.msra.mxu0 %v1057_v55 }
  0x8c   : > { %559 = vmatprep.subr.bf16.mxu0 %v1061_v56 }
  0x8f   : > { %560 = vmatpush1.bf16.msra.mxu0 %v1063_v58 }
  0x90   : > { %561 = vmatprep.subr.bf16.mxu0 %v1067_v59 }
  0x93   : > { %562 = vmatpush1.bf16.msra.mxu0 %v1071_v60 }
  0x96   : > { %564 = vmatmul.mubr.bf16.vlgmr.msra.gmra.mrb[0].mxu0 %v838_v61 }
 0x15b   : > { %v606_v63 = vpop.f32.mrb[0].mxu1 }
 0x15c   : > { %v608_v0 = vpop.f32.mrb[1].mxu1 }
 0x15d   : > { %v610_v1 = vpop.f32.mrb[2].mxu1 }
 0x15e   : > { %v611_v2 = vpop.f32.mrb[3].mxu1 }
 0x169   : > { %v565_v3 = vpop.f32.mrb[0].mxu0 }
 0x16a   : > { %v607_v4 = vadd.f32 %v606_v63, %v565_v3  ;;  %v567_v5 = vpop.f32.mrb[1].mxu0 }
 0x16b   : > { %v609_v6 = vadd.f32 %v608_v0, %v567_v5  ;;  %v569_v7 = vpop.f32.mrb[2].mxu0 }
 0x16c   : > { %v615_v8 = vpack.c.bf16 %v607_v4, %v607_v4  ;;  %v570_v9 = vpop.f32.mrb[3].mxu0  ;;  %v613_v10 = vmul.f32 0.125, %v607_v4 }
 0x16d   : > { %v682_v13 = vpack.c.bf16 %v609_v6, %v609_v6 }
 0x16e   : > { %v623_v11 = vsel %vm527_vm0, %v615_v8, 0  ;;  %v614_v12 = vpack.c.bf16 %v613_v10, %v613_v10 }
 0x16f   : > { %911 = vmatpush3.bf16.xpose.msra.mxu1 %v623_v11  ;;  %v688_v15 = vsel %vm686_vm2, %v682_v13, 0 }
 0x170   : > { %617 = vrot.lane.b32.xlu0 %v614_v12, %s1214_s15  ;;  %916 = vmatprep.subr.bf16.mxu1 %v1212_v62 }
 0x1e2   : > { %v618_v14 = vpop.permute.xlu0 %617 }
 0x1e3   : > { %913 = vmatmul.mubr.msk.bf16.vlgmr.msra.gmra.mrb[4].mxu1 %vm527_vm0, %v618_v14 }
 0x1e4   : > { %917 = vmatpush3.bf16.msra.mxu1 %v688_v15  ;;  %918 = vmatprep.mubr.msk.bf16.mxu1 %vm1213_vm1, %v1212_v62 }
 0x2b6   : > { %v659_v19 = vpop.f32.mrb[4].mxu1 }
 0x2b7   : > { %v670_v20 = vsel %vm669_vm3, %v659_v19, -inf  ;;  %v914_v21 = vpop.f32.mrb[5].mxu1 }
 0x2b8   : > { %v662_v22 = vpop.f32.mrb[6].mxu1  ;;  %v672_v23 = vsel %vm671_vm4, %v670_v20, -inf }
 0x2b9   : > { %673 = vmax.xlane.f32.xlu0 %v672_v23  ;;  %v915_v24 = vpop.f32.mrb[7].mxu1 }
 0x346   : > { %v674_v25 = vpop.xlane.xlu0 %673 }
 0x347   : > { %v675_v26 = vsub.f32 %v670_v20, %v674_v25 }
 0x349   : > { %v676_v27 = vmul.f32 1.442695, %v675_v26 }
 0x34b   : > { %1074 = vpow2.f32 %v676_v27 }
 0x355   : > { %v1075_v28 = vpop.eup %1074 }
 0x356   : > { %v678_v29 = vsel %vm671_vm4, %v1075_v28, 0.0  ;;  %v681_v30 = vpack.c.bf16 %v1075_v28, %v1075_v28 }
 0x357   : > { %679 = vadd.xlane.f32.xlu1 %v678_v29 }
 0x358   : > { %919 = vmatmul.mubr.msk.bf16.vlgmr.msra.gmra.mrb[8].mxu1 %vm671_vm4, %v681_v30 }
 0x3e4   : > { %v680_v31 = vpop.xlane.xlu1 %679 }
 0x3e5   : > { %1076 = vrcp.f32 %v680_v31 }
 0x3ef   : > { %v1077_v32 = vpop.eup %1076 }
 0x42b   : > { %v724_v33 = vpop.f32.mrb[8].mxu1 }
 0x42c   : > { %v731_v34 = vmul.f32 %v1077_v32, %v724_v33  ;;  %v920_v35 = vpop.f32.mrb[9].mxu1 }
 0x42d   : > { %v727_v36 = vpop.f32.mrb[10].mxu1 }
 0x42e   : > { %v921_v37 = vpop.f32.mrb[11].mxu1  ;;  %732 = vst.msk [vmem:[%s174_s22] sm:$0xff] %vm527_vm0, %v731_v34 }
 0x42f   : > { %1149 = shalt.err (!%p1146_p7)
}
 0x430   : > { %s1150_s18 = scalar_lea.hbm %s1396_s3, 128  ;;  %s1154_s20 = scalar_lea.hbm %s1443_s2, 256 }
 0x431   : > { %p1151_p9 = scmp.ne.s32.totalorder %s1396_s3, %s1150_s18  ;;  %p1155_p0 = scmp.lt.u32.totalorder %s1396_s3, %s1443_s2 }
 0x432   : > { %p1156_p11 = scmp.lt.u32.totalorder %s1154_s20, %s1150_s18  ;;  %p1158_p4 = scmp.lt.u32.totalorder %s1150_s18, %s1396_s3 }
 0x433   : > { %p1152_p2 = pnand %p1151_p9, %p1322_p12 }
 0x434   : > { %p1157_p1 = por %p1156_p11, %p1155_p0 }
 0x435   : > { %p1153_p5 = pneg %p1152_p2 }
 0x436   : > { %p1159_p6 = por %p1158_p4, %p1157_p1 }
 0x438   : > { %p1160_p8 = pnand %p1159_p6, %p1153_p5 }
 0x43a   : > { %1163 = shalt.err (!%p1160_p8)
}
 0x43b   : > { %930 = dma.vmem_to_hbm [thread:$0]  (%p1322_p12), %s1398_s23, 128, %s1396_s3, %s734_s13  }
 0x43c PF: > { %s759_s29 = sand.u32 1, %s1194_s9   ;;  %p1458_p10 = scmp.ne.s32.totalorder %s1448_s16, 0 }
 0x43d   : > { %p1459_p13 = scmp.ge.s32.totalorder %s1206_s12, 2  ;;  %s760_s15 = scalar_lea.sflag [#allocation4], %s759_s29 }
 0x43f   : > { %p941_p3 = pnand %p1459_p13, %p1458_p10 }
 0x441   : > { %1189 = dma.done.wait (!%p941_p3), %s760_s15, 128  }
 0x442   : > { %1191 = vsyncadd (!%p941_p3), %s760_s15, 4294967168  ;;  %p16_p7 = scmp.ge.s32.totalorder %s1287_s21, 4   ;;  %s1460_s9 = smov %s1198_s10 }
 0x443   : > { %s1461_s10 = smov %s1202_s11  ;;  %s1462_s11 = smov %s1318_s8 }
 0x444   : > { %s1463_s12 = smov %s1287_s21  ;;  %18 = sbr.rel (!%p16_p7) target bundleno = 6 (0x6), region = 77 }
 0x44b   :  { %765 = vsyncpa [#allocation3], 1 }
 0x44c   :  { %767 = vsyncpa [#allocation3 + $0x1], 1 }
 0x44d   :  { %768 = vsyncpa [#allocation6], 1 }
 0x44e   :  { %769 = vsyncpa [#allocation4], 1 }
 0x44f   :  { %771 = vsyncpa [#allocation4 + $0x1], 1 }

</bundles_post_ra>
